<compile_context>
chip_gen: v7x
topology: tpu7x:2x2x1
jax: 0.10.0
libtpu: 0.0.40
codegen_flags: <defaults>
</compile_context>

<pallas_src>
import jax
import jax.numpy as jnp
from jax import lax
from jax.experimental import pallas as pl
from jax.experimental.pallas import tpu as pltpu

_LANES = 128
_SUBLANES = 8
_TILE_ROWS = 2048          # per-input block (2048, 128) f32 = 1 MiB
_PALLAS_MIN_N = 1 << 20    # below ~1M elements the fused XLA path wins


def _num_parallel_cores():
    """TensorCores a 'parallel' grid axis is sharded across on this device."""
    try:
        kind = jax.devices()[0].device_kind.lower()
    except Exception:
        return 1
    # Megacore (v4 / v5p) and v7x expose 2 TensorCores per Pallas device.
    if any(tag in kind for tag in ("v4", "v5p", "v7", "7x")):
        return 2
    return 1


def _margin_ranking_sum_kernel(margin_ref, n_ref, pos_ref, neg_ref, out_ref):
    """One (core, tile) grid step of the streaming margin-ranking reduction.

    margin_ref : SMEM (1,) f32   -> margin
    n_ref      : SMEM (1,) i32   -> true element count (for tail masking)
    pos_ref    : VMEM (block_rows, 128)
    neg_ref    : VMEM (block_rows, 128)
    out_ref    : VMEM (8, 128) f32 -> per-core partial sums (resident across i)
    """
    c = pl.program_id(0)
    i = pl.program_id(1)

    @pl.when(i == 0)
    def _init():
        out_ref[...] = jnp.zeros_like(out_ref)

    block_rows, lanes = pos_ref.shape
    # Logical (unclamped) tile id -> global element offset of this block.
    tile = c * pl.num_programs(1) + i
    start = tile * (block_rows * lanes)

    pos = pos_ref[...].astype(jnp.float32)
    neg = neg_ref[...].astype(jnp.float32)
    # MarginRankingLoss with y = -1:  loss_i = max(0, pos_i - neg_i + margin)
    per = jnp.maximum(pos - neg + margin_ref[0], 0.0)

    # Mask the ragged tail, padded lanes, and any clamped / out-of-bounds rows.
    row_ids = lax.broadcasted_iota(jnp.int32, (block_rows, lanes), 0)
    col_ids = lax.broadcasted_iota(jnp.int32, (block_rows, lanes), 1)
    idx = start + row_ids * lanes + col_ids
    per = jnp.where(idx < n_ref[0], per, 0.0)

    # (block_rows, 128) -> (block_rows//8, 8, 128); summing the leading axis is
    # pure VPU vreg adds (no per-step cross-lane/sublane XLU reduction).
    partial = per.reshape(block_rows // _SUBLANES, _SUBLANES, lanes).sum(axis=0)
    out_ref[...] += partial


def margin_ranking_loss(positive_scores, negative_scores, margin, *,
                        force_pallas=False):
    """Pallas-backed equivalent of BaseModel.compute_loss (y = -1, mean)."""
    assert positive_scores.shape == negative_scores.shape
    assert positive_scores.ndim == 1
    n = positive_scores.shape[0]

    if n == 0 or (n < _PALLAS_MIN_N and not force_pallas):
        # Small batches: kernel launch + DMA setup dominates; let XLA fuse it.
        return jnp.mean(jnp.maximum(
            positive_scores.astype(jnp.float32)
            - negative_scores.astype(jnp.float32) + jnp.float32(margin), 0.0))

    # Stream bf16 as bf16 (halves HBM bytes); everything else streams as f32.
    if (positive_scores.dtype == jnp.bfloat16
            and negative_scores.dtype == jnp.bfloat16):
        dtype = jnp.bfloat16
    else:
        dtype = jnp.float32
    pos = positive_scores.astype(dtype)
    neg = negative_scores.astype(dtype)

    # Lane/sublane-dense layout: pad only up to one (8,128) vreg; when n is
    # already a multiple the reshape is a free bitcast (no extra HBM pass).
    vreg = _SUBLANES * _LANES
    padded_n = ((n + vreg - 1) // vreg) * vreg
    pad = padded_n - n
    if pad:
        pos = jnp.pad(pos, (0, pad))
        neg = jnp.pad(neg, (0, pad))
    rows = padded_n // _LANES
    pos2 = pos.reshape(rows, _LANES)
    neg2 = neg.reshape(rows, _LANES)

    block_rows = _TILE_ROWS if rows >= _TILE_ROWS else rows  # rows % 8 == 0
    num_tiles = pl.cdiv(rows, block_rows)
    num_cores = _num_parallel_cores() if num_tiles > 1 else 1
    tiles_per_core = pl.cdiv(num_tiles, num_cores)
    needs_clamp = num_cores * tiles_per_core > num_tiles

    def data_map(c, i):
        t = c * tiles_per_core + i
        if needs_clamp:
            # A core's trailing (fully out-of-range) step re-reads the last
            # real tile; its contribution is masked to zero in-kernel.
            t = jnp.minimum(t, num_tiles - 1)
        return (t, 0)

    margin_arr = jnp.asarray([margin], dtype=jnp.float32)
    n_arr = jnp.asarray([n], dtype=jnp.int32)

    itemsize = 2 if dtype == jnp.bfloat16 else 4
    cost = pl.CostEstimate(
        flops=6 * padded_n,
        transcendentals=0,
        bytes_accessed=2 * padded_n * itemsize
        + num_cores * _SUBLANES * _LANES * 4)

    out = pl.pallas_call(
        _margin_ranking_sum_kernel,
        out_shape=jax.ShapeDtypeStruct((num_cores, _SUBLANES, _LANES),
                                       jnp.float32),
        grid_spec=pltpu.PrefetchScalarGridSpec(
            num_scalar_prefetch=0,
            grid=(num_cores, tiles_per_core),
            in_specs=[
                pl.BlockSpec(memory_space=pltpu.MemorySpace.SMEM),
                pl.BlockSpec(memory_space=pltpu.MemorySpace.SMEM),
                pl.BlockSpec((block_rows, _LANES), data_map),
                pl.BlockSpec((block_rows, _LANES), data_map),
            ],
            out_specs=pl.BlockSpec((None, _SUBLANES, _LANES),
                                   lambda c, i: (c, 0, 0)),
        ),
        compiler_params=pltpu.CompilerParams(
            dimension_semantics=("parallel", "arbitrary")),
        cost_estimate=cost,
    )(margin_arr, n_arr, pos2, neg2)

    # Per-core (8,128) partial sums -> scalar mean (cheap: <= 2048 floats).
    return jnp.sum(out) * jnp.float32(1.0 / n)


class BaseModelPallas:
    """JAX/Pallas mirror of the concrete parts of BaseModel."""

    def __init__(self, config):
        self.config = config
        self.margin = config["margin"]
        self.embedding_norm = config["embedding_norm"]
        self.distance_norm = config["distance_norm"]
        self.e_num = config["e_num"]
        self.r_num = config["r_num"]
        self.dim = config["dim"]
        # Deterministic synthetic embedding tables (shapes implied by config).
        ke, kr = jax.random.split(jax.random.PRNGKey(42))
        self.e_embedding = jax.random.normal(
            ke, (self.e_num, self.dim), dtype=jnp.float32)
        self.r_embedding = jax.random.normal(
            kr, (self.r_num, self.dim), dtype=jnp.float32)

    def compute_loss(self, positive_scores, negative_scores):
        return margin_ranking_loss(positive_scores, negative_scores, self.margin)

    def replace_entity_embedding(self, embedding):
        self.e_embedding = embedding

    def replace_relation_embedding(self, embedding):
        self.r_embedding = embedding

    # TODO(synk): forward() and score_triples() are @abstractmethod in the
    # PyTorch BaseModel (no concrete semantics to translate).


if __name__ == "__main__":
    config = {
        "margin": 1.0,
        "embedding_norm": 2,
        "distance_norm": 1,
        "e_num": 16,
        "r_num": 4,
        "dim": 32,
    }
    model = BaseModelPallas(config)

    key = jax.random.PRNGKey(0)
    k1, k2, k3, k4, k5, k6 = jax.random.split(key, 6)

    # 1) Tiny batch (typical module usage) -> fused pure-XLA bypass path.
    small = 8
    pos_s = jax.random.normal(k1, (small,), dtype=jnp.float32)
    neg_s = jax.random.normal(k2, (small,), dtype=jnp.float32)
    loss_s = jax.block_until_ready(model.compute_loss(pos_s, neg_s))
    ref_s = jnp.mean(jnp.maximum(pos_s - neg_s + config["margin"], 0.0))
    assert jnp.allclose(loss_s, ref_s, atol=1e-6, rtol=1e-6), (loss_s, ref_s)

    # 2) Single-tile Pallas path with a ragged tail (n not a multiple of 1024).
    big = 20000
    pos_b = jax.random.normal(k3, (big,), dtype=jnp.float32)
    neg_b = jax.random.normal(k4, (big,), dtype=jnp.float32)
    loss_b = jax.block_until_ready(
        margin_ranking_loss(pos_b, neg_b, config["margin"], force_pallas=True))
    ref_b = jnp.mean(jnp.maximum(pos_b - neg_b + config["margin"], 0.0))
    assert jnp.allclose(loss_b, ref_b, atol=1e-5, rtol=1e-5), (loss_b, ref_b)

    # 3) Multi-tile Pallas path (odd tile count -> exercises the clamped,
    #    masked-out redundant step on 2-core devices) + ragged tail.
    huge = 3 * _TILE_ROWS * _LANES - 37
    pos_h = jax.random.normal(k5, (huge,), dtype=jnp.float32)
    neg_h = jax.random.normal(k6, (huge,), dtype=jnp.float32)
    loss_h = jax.block_until_ready(
        margin_ranking_loss(pos_h, neg_h, config["margin"], force_pallas=True))
    ref_h = jnp.mean(jnp.maximum(pos_h - neg_h + config["margin"], 0.0))
    assert jnp.allclose(loss_h, ref_h, atol=1e-4, rtol=1e-4), (loss_h, ref_h)

    print("KERNEL_OK")
</pallas_src>

<mosaic_0001>
module attributes {stable_mosaic.version = 11 : i64} {
  func.func @_margin_ranking_sum_kernel(%arg0: i32, %arg1: i32, %arg2: memref<1xf32, #tpu.memory_space<smem>>, %arg3: memref<1xi32, #tpu.memory_space<smem>>, %arg4: memref<160x128xf32, #tpu.memory_space<vmem>>, %arg5: memref<160x128xf32, #tpu.memory_space<vmem>>, %arg6: memref<1x8x128xf32, #tpu.memory_space<vmem>>) attributes {dimension_semantics = [#tpu.dimension_semantics<parallel>, #tpu.dimension_semantics<arbitrary>], iteration_bounds = array<i64: 1, 1>, scalar_prefetch = 0 : i64, scratch_operands = 0 : i64, tpu.core_type = #tpu.core_type<tc>, window_params = [{transform_indices = @transform_0, window_bounds = array<i64: 1>}, {transform_indices = @transform_1, window_bounds = array<i64: 1>}, {transform_indices = @transform_2, window_bounds = array<i64: 160, 128>}, {transform_indices = @transform_3, window_bounds = array<i64: 160, 128>}, {transform_indices = @transform_4, window_bounds = array<i64: 1, 8, 128>}]} {
    %c0_i32 = arith.constant 0 : i32
    %0 = arith.cmpi eq, %arg1, %c0_i32 : i32
    %1 = arith.extui %0 : i1 to i32
    %c0_i32_0 = arith.constant 0 : i32
    %2 = arith.cmpi ne, %1, %c0_i32_0 : i32
    scf.if %2 {
      %cst_14 = arith.constant 0.000000e+00 : f32
      %34 = vector.broadcast %cst_14 : f32 to vector<8x128xf32>
      %c0_15 = arith.constant 0 : index
      %c0_16 = arith.constant 0 : index
      %c0_17 = arith.constant 0 : index
      %35 = vector.load %arg6[%c0_15, %c0_16, %c0_17] : memref<1x8x128xf32, #tpu.memory_space<vmem>>, vector<1x8x128xf32>
      %36 = vector.shape_cast %35 : vector<1x8x128xf32> to vector<8x128xf32>
      %37 = vector.shape_cast %34 : vector<8x128xf32> to vector<1x8x128xf32>
      tpu.vector_store %arg6[%c0_15, %c0_16, %c0_17], %37 {strides = array<i32>} : memref<1x8x128xf32, #tpu.memory_space<vmem>>, vector<1x8x128xf32>,
    } else {
    }
    %c1_i32 = arith.constant 1 : i32
    %3 = arith.muli %arg0, %c1_i32 : i32
    %4 = arith.addi %3, %arg1 : i32
    %c20480_i32 = arith.constant 20480 : i32
    %5 = arith.muli %4, %c20480_i32 : i32
    %c0 = arith.constant 0 : index
    %c0_1 = arith.constant 0 : index
    %6 = vector.load %arg4[%c0, %c0_1] : memref<160x128xf32, #tpu.memory_space<vmem>>, vector<160x128xf32>
    %c0_2 = arith.constant 0 : index
    %c0_3 = arith.constant 0 : index
    %7 = vector.load %arg5[%c0_2, %c0_3] : memref<160x128xf32, #tpu.memory_space<vmem>>, vector<160x128xf32>
    %8 = arith.subf %6, %7 : vector<160x128xf32>
    %c0_4 = arith.constant 0 : index
    %9 = memref.load %arg2[%c0_4] : memref<1xf32, #tpu.memory_space<smem>>
    %10 = vector.broadcast %9 : f32 to vector<160x128xf32>
    %11 = arith.addf %8, %10 : vector<160x128xf32>
    %cst = arith.constant 0.000000e+00 : f32
    %12 = vector.broadcast %cst : f32 to vector<160x128xf32>
    %13 = arith.maximumf %11, %12 : vector<160x128xf32>
    %14 = tpu.iota {dimensions = array<i32: 0>} : vector<160x128xi32>
    %15 = tpu.iota {dimensions = array<i32: 1>} : vector<160x128xi32>
    %c128_i32 = arith.constant 128 : i32
    %16 = vector.broadcast %c128_i32 : i32 to vector<160x128xi32>
    %17 = arith.muli %14, %16 : vector<160x128xi32>
    %18 = vector.broadcast %5 : i32 to vector<160x128xi32>
    %19 = arith.addi %18, %17 : vector<160x128xi32>
    %20 = arith.addi %19, %15 : vector<160x128xi32>
    %c0_5 = arith.constant 0 : index
    %21 = memref.load %arg3[%c0_5] : memref<1xi32, #tpu.memory_space<smem>>
    %22 = vector.broadcast %21 : i32 to vector<160x128xi32>
    %23 = arith.cmpi slt, %20, %22 : vector<160x128xi32>
    %cst_6 = arith.constant 0.000000e+00 : f32
    %24 = vector.broadcast %cst_6 : f32 to vector<160x128xf32>
    %25 = arith.select %23, %13, %24 : vector<160x128xi1>, vector<160x128xf32>
    %26 = vector.shape_cast %25 : vector<160x128xf32> to vector<20x8x128xf32>
    %cst_7 = arith.constant dense<0.000000e+00> : vector<8x128xf32>
    %27 = vector.multi_reduction <add>, %26, %cst_7 [0] : vector<20x8x128xf32> to vector<8x128xf32>
    %c0_8 = arith.constant 0 : index
    %c0_9 = arith.constant 0 : index
    %c0_10 = arith.constant 0 : index
    %28 = vector.load %arg6[%c0_8, %c0_9, %c0_10] : memref<1x8x128xf32, #tpu.memory_space<vmem>>, vector<1x8x128xf32>
    %29 = vector.shape_cast %28 : vector<1x8x128xf32> to vector<8x128xf32>
    %30 = arith.addf %29, %27 : vector<8x128xf32>
    %c0_11 = arith.constant 0 : index
    %c0_12 = arith.constant 0 : index
    %c0_13 = arith.constant 0 : index
    %31 = vector.load %arg6[%c0_11, %c0_12, %c0_13] : memref<1x8x128xf32, #tpu.memory_space<vmem>>, vector<1x8x128xf32>
    %32 = vector.shape_cast %31 : vector<1x8x128xf32> to vector<8x128xf32>
    %33 = vector.shape_cast %30 : vector<8x128xf32> to vector<1x8x128xf32>
    tpu.vector_store %arg6[%c0_11, %c0_12, %c0_13], %33 {strides = array<i32>} : memref<1x8x128xf32, #tpu.memory_space<vmem>>, vector<1x8x128xf32>,
    return
  }
  func.func @transform_0(%arg0: i32, %arg1: i32) -> i32 {
    %c0_i32 = arith.constant 0 : i32
    %c0_i32_0 = arith.constant 0 : i32
    return %c0_i32 : i32
  }
  func.func @transform_1(%arg0: i32, %arg1: i32) -> i32 {
    %c0_i32 = arith.constant 0 : i32
    %c0_i32_0 = arith.constant 0 : i32
    return %c0_i32 : i32
  }
  func.func @transform_2(%arg0: i32, %arg1: i32) -> (i32, i32) {
    %c1_i32 = arith.constant 1 : i32
    %0 = arith.muli %arg0, %c1_i32 : i32
    %1 = arith.addi %0, %arg1 : i32
    %c0_i32 = arith.constant 0 : i32
    %c0_i32_0 = arith.constant 0 : i32
    return %1, %c0_i32 : i32, i32
  }
  func.func @transform_3(%arg0: i32, %arg1: i32) -> (i32, i32) {
    %c1_i32 = arith.constant 1 : i32
    %0 = arith.muli %arg0, %c1_i32 : i32
    %1 = arith.addi %0, %arg1 : i32
    %c0_i32 = arith.constant 0 : i32
    %c0_i32_0 = arith.constant 0 : i32
    return %1, %c0_i32 : i32, i32
  }
  func.func @transform_4(%arg0: i32, %arg1: i32) -> (i32, i32, i32) {
    %c0_i32 = arith.constant 0 : i32
    %c0_i32_0 = arith.constant 0 : i32
    %c0_i32_1 = arith.constant 0 : i32
    return %arg0, %c0_i32, %c0_i32_0 : i32, i32, i32
  }
}

</mosaic_0001>

<bundles_post_ra>
// kernel: tpu_custom_call.1
= control target key start
LH: loop header
LB: loop body
LE: loop exit
PB: predicated region body
PF: predicated region fallthrough
CT: control target
= control target key end

     0   :  { %11 = vsyncpa [#allocation5], 0  ;;  %s613_s0 = inlined_call_operand.<no memory space> [shape: f32[1], index: 0, kind: input, shape index: {}]   ;;  %s614_s1 = inlined_call_operand.<no memory space> [shape: s32[1], index: 1, kind: input, shape index: {}]   ;;  %s615_s2 = inlined_call_operand.hbm [shape: f32[160,128], index: 2, kind: input, shape index: {}]   ;;  %s616_s3 = inlined_call_operand.hbm [shape: f32[160,128], index: 3, kind: input, shape index: {}]   ;;  %s617_s4 = inlined_call_operand.hbm [shape: f32[1,8,128], index: 4, kind: output, shape index: {}]  }
   0x1   :  { %12 = vsyncpa [#allocation8], 0 }
   0x2   :  { %13 = vsyncpa [#allocation6], 0  ;;  %s411_s15 = smov [#allocation4]   ;;  %s339_s19 = scalar_lea.hbm %s615_s2, 2560 }
   0x3   :  { %s27_s16 = sshll.u32 %s411_s15, 4  ;;  %p340_p0 = scmp.ne.s32.totalorder %s615_s2, %s339_s19  ;;  %s28_s16 = int_to_ptr.vmem [resolvable:$true] %s27_s16 }
   0x4   :  { %p343_p1 = scmp.lt.u32.totalorder %s339_s19, %s615_s2 }
   0x6   :  { %p345_p2 = pnand %p343_p1, %p340_p0 }
   0x8   :  { %348 = shalt.err (!%p345_p2)
}
   0x9   :  { %s349_s24 = scalar_lea.vmem %s28_s16, 2560  ;;  %p354_p4 = scmp.lt.s32.totalorder %s28_s16, %s28_s16 }
   0xa   :  { %p350_p3 = scmp.ne.s32.totalorder %s28_s16, %s349_s24  ;;  %p355_p5 = scmp.lt.s32.totalorder %s349_s24, %s349_s24 }
   0xc   :  { %p356_p6 = por %p355_p5, %p354_p4 }
   0xe   :  { %p357_p7 = pnand %p356_p6, %p350_p3 }
  0x10   :  { %360 = shalt.err (!%p357_p7)
}
  0x11   :  { %s412_s25 = smov 128   ;;  %s413_s26 = smov 8  }
  0x12   :  { %33 = dma.hbm_to_vmem [thread:$0]  %s615_s2, 2560, %s28_s16, [#allocation5], %s412_s25, %s412_s25, %s413_s26  }
  0x13   :  { %s414_s29 = smov [#allocation7]   ;;  %s361_s7 = scalar_lea.hbm %s616_s3, 2560 }
  0x14   :  { %s43_s30 = sshll.u32 %s414_s29, 4  ;;  %p362_p8 = scmp.ne.s32.totalorder %s616_s3, %s361_s7  ;;  %s44_s30 = int_to_ptr.vmem [resolvable:$true] %s43_s30 }
  0x15   :  { %p365_p9 = scmp.lt.u32.totalorder %s361_s7, %s616_s3 }
  0x17   :  { %p367_p10 = pnand %p365_p9, %p362_p8 }
  0x19   :  { %370 = shalt.err (!%p367_p10)
}
  0x1a   :  { %s371_s12 = scalar_lea.vmem %s44_s30, 2560  ;;  %p376_p12 = scmp.lt.s32.totalorder %s44_s30, %s44_s30 }
  0x1b   :  { %p372_p11 = scmp.ne.s32.totalorder %s44_s30, %s371_s12  ;;  %p377_p13 = scmp.lt.s32.totalorder %s371_s12, %s371_s12 }
  0x1d   :  { %p378_p0 = por %p377_p13, %p376_p12 }
  0x1f   :  { %p379_p1 = pnand %p378_p0, %p372_p11 }
  0x21   :  { %382 = shalt.err (!%p379_p1)
}
  0x22   :  { %49 = dma.hbm_to_vmem [thread:$0]  %s616_s3, 2560, %s44_s30, [#allocation8], %s412_s25, %s412_s25, %s413_s26  }
  0x23   :  { %405 = dma.done.wait [#allocation5], 2560  }
  0x24   :  { %406 = vsyncadd [#allocation5], 4294964736 }
  0x25   :  { %407 = dma.done.wait [#allocation8], 2560  }
  0x26   :  { %408 = vsyncadd [#allocation8], 4294964736  ;;  %v169_v0 = vlaneseq  ;;  %v67_v2 = vld [vmem:[#allocation4] sm:$0xff]  ;;  %v68_v3 = vld [vmem:[#allocation4 + $0x8] sm:$0xff]  ;;  %v471_v9 = vstv %s613_s0  ;;  %v477_v11 = vstv %s614_s1  ;;  %s415_s0 = smov [#allocation9]  }
  0x27   :  { %v87_v4 = vld [vmem:[#allocation7] sm:$0xff]  ;;  %v88_v5 = vld [vmem:[#allocation7 + $0x8] sm:$0xff]  ;;  %v69_v7 = vld [vmem:[#allocation4 + $0x10] sm:$0xff]  ;;  %s323_s1 = sshll.u32 %s415_s0, 4  ;;  %s324_s1 = int_to_ptr.vmem [resolvable:$true] %s323_s1 }
  0x28   :  { %v465_v1 = vshrl.u32 %v169_v0, 7  ;;  %v89_v8 = vld [vmem:[#allocation7 + $0x10] sm:$0xff]  ;;  %v107_v12 = vsub.f32 %v67_v2, %v87_v4  ;;  %v108_v13 = vsub.f32 %v68_v3, %v88_v5  ;;  %v480_v15 = vand.u32 127, %v169_v0  ;;  %v70_v16 = vld [vmem:[#allocation4 + $0x18] sm:$0xff]  ;;  %v71_v26 = vld [vmem:[#allocation4 + $0x20] sm:$0xff]  ;;  %s383_s17 = scalar_lea.vmem %s324_s1, 128  ;;  %p388_p3 = scmp.lt.s32.totalorder %s324_s1, %s324_s1 }
  0x29   :  { %v90_v17 = vld [vmem:[#allocation7 + $0x18] sm:$0xff]  ;;  %v109_v22 = vsub.f32 %v69_v7, %v89_v8  ;;  %v91_v27 = vld [vmem:[#allocation7 + $0x20] sm:$0xff]  ;;  %v72_v36 = vld [vmem:[#allocation4 + $0x28] sm:$0xff]  ;;  %p384_p2 = scmp.ne.s32.totalorder %s324_s1, %s383_s17  ;;  %p389_p4 = scmp.lt.s32.totalorder %s383_s17, %s383_s17 }
  0x2a   :  { %v171_v6 = vadd.s32 8, %v465_v1  ;;  %v172_v10 = vadd.s32 16, %v465_v1  ;;  %v173_v14 = vadd.s32 24, %v465_v1  ;;  %v174_v18 = vadd.s32 32, %v465_v1  ;;  %v92_v37 = vld [vmem:[#allocation7 + $0x28] sm:$0xff]  ;;  %v73_v46 = vld [vmem:[#allocation4 + $0x30] sm:$0xff] }
  0x2b   :  { %v175_v19 = vadd.s32 40, %v465_v1  ;;  %v192_v20 = vmul.u32 128, %v465_v1  ;;  %v486_v23 = vadd.s32 48, %v465_v1  ;;  %v489_v24 = vadd.s32 56, %v465_v1  ;;  %v93_v47 = vld [vmem:[#allocation7 + $0x30] sm:$0xff]  ;;  %v74_v52 = vld [vmem:[#allocation4 + $0x38] sm:$0xff]  ;;  %p390_p5 = por %p389_p4, %p388_p3 }
  0x2c   :  { %v193_v21 = vmul.u32 128, %v171_v6  ;;  %v492_v25 = vadd.s32 64, %v465_v1  ;;  %v495_v28 = vadd.s32 72, %v465_v1  ;;  %v498_v29 = vadd.s32 80, %v465_v1  ;;  %v94_v53 = vld [vmem:[#allocation7 + $0x38] sm:$0xff]  ;;  %v75_v0 = vld [vmem:[#allocation4 + $0x40] sm:$0xff] }
  0x2d   :  { %v501_v30 = vadd.s32 88, %v465_v1  ;;  %v194_v31 = vmul.u32 128, %v172_v10  ;;  %v110_v32 = vsub.f32 %v70_v16, %v90_v17  ;;  %v129_v33 = vadd.f32 %v471_v9, %v107_v12  ;;  %v95_v2 = vld [vmem:[#allocation7 + $0x40] sm:$0xff]  ;;  %v76_v12 = vld [vmem:[#allocation4 + $0x48] sm:$0xff]  ;;  %p391_p6 = pnand %p390_p5, %p384_p2 }
  0x2e   :  { %v130_v34 = vadd.f32 %v471_v9, %v108_v13  ;;  %v506_v35 = vadd.s32 96, %v465_v1  ;;  %v509_v38 = vadd.s32 104, %v465_v1  ;;  %v195_v39 = vmul.u32 128, %v173_v14  ;;  %v96_v13 = vld [vmem:[#allocation7 + $0x48] sm:$0xff] }
  0x2f   :  { %v233_v40 = vadd.s32 %v192_v20, %v480_v15  ;;  %v234_v41 = vadd.s32 %v193_v21, %v480_v15  ;;  %v111_v42 = vsub.f32 %v71_v26, %v91_v27  ;;  %v131_v43 = vadd.f32 %v471_v9, %v109_v22  ;;  %v77_v22 = vld [vmem:[#allocation4 + $0x50] sm:$0xff] }
  0x30   :  { %v515_v44 = vadd.s32 112, %v465_v1  ;;  %v518_v45 = vadd.s32 120, %v465_v1  ;;  %v521_v48 = vadd.s32 128, %v465_v1  ;;  %v524_v49 = vadd.s32 136, %v465_v1 }
  0x31   :  { %v196_v50 = vmul.u32 128, %v174_v18  ;;  %v235_v51 = vadd.s32 %v194_v31, %v480_v15  ;;  %v112_v54 = vsub.f32 %v72_v36, %v92_v37  ;;  %v132_v55 = vadd.f32 %v471_v9, %v110_v32  ;;  %v98_v36 = vld [vmem:[#allocation7 + $0x58] sm:$0xff] }
  0x32   :  { %v149_v56 = vmax.f32 %v129_v33, 0.0  ;;  %v150_v57 = vmax.f32 %v130_v34, 0.0  ;;  %v197_v58 = vmul.u32 128, %v175_v19  ;;  %v236_v59 = vadd.s32 %v195_v39, %v480_v15  ;;  %v78_v34 = vld [vmem:[#allocation4 + $0x58] sm:$0xff] }
  0x33   :  { %vm255_vm0 = vcmp.lt.s32.totalorder %v233_v40, %v477_v11  ;;  %vm256_vm1 = vcmp.lt.s32.totalorder %v234_v41, %v477_v11  ;;  %v113_v60 = vsub.f32 %v73_v46, %v93_v47  ;;  %v133_v61 = vadd.f32 %v471_v9, %v111_v42  ;;  %v79_v46 = vld [vmem:[#allocation4 + $0x60] sm:$0xff] }
  0x34   :  { %v151_v62 = vmax.f32 %v131_v43, 0.0  ;;  %v533_v63 = vadd.s32 144, %v465_v1  ;;  %v114_v3 = vsub.f32 %v74_v52, %v94_v53  ;;  %v198_v4 = vmul.u32 128, %v486_v23  ;;  %v97_v23 = vld [vmem:[#allocation7 + $0x50] sm:$0xff]  ;;  %v99_v47 = vld [vmem:[#allocation7 + $0x60] sm:$0xff] }
  0x35   :  { %v237_v5 = vadd.s32 %v196_v50, %v480_v15  ;;  %vm257_vm2 = vcmp.lt.s32.totalorder %v235_v51, %v477_v11  ;;  %v134_v6 = vadd.f32 %v471_v9, %v112_v54  ;;  %v152_v7 = vmax.f32 %v132_v55, 0.0 }
  0x36   :  { %v275_v8 = vsel %vm255_vm0, %v149_v56, 0.0  ;;  %v276_v10 = vsel %vm256_vm1, %v150_v57, 0.0  ;;  %v540_v14 = vadd.s32 152, %v465_v1  ;;  %v199_v16 = vmul.u32 128, %v489_v24  ;;  %v80_v56 = vld [vmem:[#allocation4 + $0x68] sm:$0xff] }
  0x37   :  { %v238_v17 = vadd.s32 %v197_v58, %v480_v15  ;;  %vm258_vm3 = vcmp.lt.s32.totalorder %v236_v59, %v477_v11  ;;  %v115_v18 = vsub.f32 %v75_v0, %v95_v2  ;;  %v135_v19 = vadd.f32 %v471_v9, %v113_v60  ;;  %v100_v57 = vld [vmem:[#allocation7 + $0x68] sm:$0xff]  ;;  %v81_v2 = vld [vmem:[#allocation4 + $0x70] sm:$0xff] }
  0x38   :  { %v153_v20 = vmax.f32 %v133_v61, 0.0  ;;  %v277_v21 = vsel %vm257_vm2, %v151_v62, 0.0  ;;  %v200_v26 = vmul.u32 128, %v492_v25  ;;  %v239_v27 = vadd.s32 %v198_v4, %v480_v15 }
  0x39   :  { %vm259_vm4 = vcmp.lt.s32.totalorder %v237_v5, %v477_v11  ;;  %v295_v1 = vadd.f32 %v276_v10, %v275_v8  ;;  %v116_v31 = vsub.f32 %v76_v12, %v96_v13  ;;  %v136_v24 = vadd.f32 %v471_v9, %v114_v3  ;;  %v101_v3 = vld [vmem:[#allocation7 + $0x70] sm:$0xff]  ;;  %v82_v12 = vld [vmem:[#allocation4 + $0x78] sm:$0xff] }
  0x3a   :  { %v154_v32 = vmax.f32 %v134_v6, 0.0  ;;  %v278_v33 = vsel %vm258_vm3, %v152_v7, 0.0  ;;  %v201_v37 = vmul.u32 128, %v495_v28  ;;  %v240_v39 = vadd.s32 %v199_v16, %v480_v15  ;;  %v102_v13 = vld [vmem:[#allocation7 + $0x78] sm:$0xff] }
  0x3b   :  { %vm260_vm5 = vcmp.lt.s32.totalorder %v238_v17, %v477_v11  ;;  %v296_v40 = vadd.f32 %v295_v1, %v277_v21  ;;  %v117_v25 = vsub.f32 %v77_v22, %v97_v23  ;;  %v137_v41 = vadd.f32 %v471_v9, %v115_v18  ;;  %v83_v22 = vld [vmem:[#allocation4 + $0x80] sm:$0xff] }
  0x3c   :  { %v155_v42 = vmax.f32 %v135_v19, 0.0  ;;  %v279_v43 = vsel %vm259_vm4, %v153_v20, 0.0  ;;  %v202_v50 = vmul.u32 128, %v498_v29  ;;  %v241_v51 = vadd.s32 %v200_v26, %v480_v15  ;;  %v103_v23 = vld [vmem:[#allocation7 + $0x80] sm:$0xff] }
  0x3d   :  { %vm261_vm6 = vcmp.lt.s32.totalorder %v239_v27, %v477_v11  ;;  %v297_v52 = vadd.f32 %v296_v40, %v278_v33  ;;  %v118_v28 = vsub.f32 %v78_v34, %v98_v36  ;;  %v138_v53 = vadd.f32 %v471_v9, %v116_v31  ;;  %v84_v33 = vld [vmem:[#allocation4 + $0x88] sm:$0xff] }
  0x3e   :  { %v156_v54 = vmax.f32 %v136_v24, 0.0  ;;  %v280_v55 = vsel %vm260_vm5, %v154_v32, 0.0  ;;  %v203_v58 = vmul.u32 128, %v501_v30  ;;  %v242_v59 = vadd.s32 %v201_v37, %v480_v15  ;;  %v104_v34 = vld [vmem:[#allocation7 + $0x88] sm:$0xff] }
  0x3f   :  { %vm262_vm7 = vcmp.lt.s32.totalorder %v240_v39, %v477_v11  ;;  %v298_v60 = vadd.f32 %v297_v52, %v279_v43  ;;  %v119_v29 = vsub.f32 %v79_v46, %v99_v47  ;;  %v139_v61 = vadd.f32 %v471_v9, %v117_v25  ;;  %v105_v43 = vld [vmem:[#allocation7 + $0x90] sm:$0xff] }
  0x40   :  { %v157_v62 = vmax.f32 %v137_v41, 0.0  ;;  %v281_v0 = vsel %vm261_vm6, %v155_v42, 0.0  ;;  %v204_v4 = vmul.u32 128, %v506_v35  ;;  %v243_v5 = vadd.s32 %v202_v50, %v480_v15  ;;  %v85_v42 = vld [vmem:[#allocation4 + $0x90] sm:$0xff] }
  0x41   :  { %vm263_vm8 = vcmp.lt.s32.totalorder %v241_v51, %v477_v11  ;;  %v299_v6 = vadd.f32 %v298_v60, %v280_v55  ;;  %v120_v30 = vsub.f32 %v80_v56, %v100_v57  ;;  %v140_v7 = vadd.f32 %v471_v9, %v118_v28 }
  0x42   :  { %v158_v8 = vmax.f32 %v138_v53, 0.0  ;;  %v282_v10 = vsel %vm262_vm7, %v156_v54, 0.0  ;;  %v205_v16 = vmul.u32 128, %v509_v38  ;;  %v244_v17 = vadd.s32 %v203_v58, %v480_v15  ;;  %v86_v53 = vld [vmem:[#allocation4 + $0x98] sm:$0xff] }
  0x43   :  { %vm264_vm9 = vcmp.lt.s32.totalorder %v242_v59, %v477_v11  ;;  %v300_v18 = vadd.f32 %v299_v6, %v281_v0  ;;  %v121_v35 = vsub.f32 %v81_v2, %v101_v3  ;;  %v141_v19 = vadd.f32 %v471_v9, %v119_v29  ;;  %v106_v54 = vld [vmem:[#allocation7 + $0x98] sm:$0xff] }
  0x44   :  { %v159_v20 = vmax.f32 %v139_v61, 0.0  ;;  %v283_v21 = vsel %vm263_vm8, %v157_v62, 0.0  ;;  %v206_v26 = vmul.u32 128, %v515_v44  ;;  %v245_v27 = vadd.s32 %v204_v4, %v480_v15 }
  0x45   :  { %vm265_vm10 = vcmp.lt.s32.totalorder %v243_v5, %v477_v11  ;;  %v301_v1 = vadd.f32 %v300_v18, %v282_v10  ;;  %v122_v38 = vsub.f32 %v82_v12, %v102_v13  ;;  %v142_v31 = vadd.f32 %v471_v9, %v120_v30 }
  0x46   :  { %v160_v24 = vmax.f32 %v140_v7, 0.0  ;;  %v284_v32 = vsel %vm264_vm9, %v158_v8, 0.0  ;;  %v207_v36 = vmul.u32 128, %v518_v45  ;;  %v246_v37 = vadd.s32 %v205_v16, %v480_v15 }
  0x47   :  { %vm266_vm11 = vcmp.lt.s32.totalorder %v244_v17, %v477_v11  ;;  %v302_v39 = vadd.f32 %v301_v1, %v283_v21  ;;  %v123_v44 = vsub.f32 %v83_v22, %v103_v23  ;;  %v143_v40 = vadd.f32 %v471_v9, %v121_v35 }
  0x48   :  { %v161_v25 = vmax.f32 %v141_v19, 0.0  ;;  %v285_v41 = vsel %vm265_vm10, %v159_v20, 0.0  ;;  %v208_v46 = vmul.u32 128, %v521_v48  ;;  %v247_v47 = vadd.s32 %v206_v26, %v480_v15 }
  0x49   :  { %vm267_vm12 = vcmp.lt.s32.totalorder %v245_v27, %v477_v11  ;;  %v303_v50 = vadd.f32 %v302_v39, %v284_v32  ;;  %v124_v45 = vsub.f32 %v84_v33, %v104_v34  ;;  %v144_v51 = vadd.f32 %v471_v9, %v122_v38 }
  0x4a   :  { %v162_v52 = vmax.f32 %v142_v31, 0.0  ;;  %v286_v28 = vsel %vm266_vm11, %v160_v24, 0.0  ;;  %v209_v55 = vmul.u32 128, %v524_v49  ;;  %v248_v56 = vadd.s32 %v207_v36, %v480_v15 }
  0x4b   :  { %vm268_vm13 = vcmp.lt.s32.totalorder %v246_v37, %v477_v11  ;;  %v304_v57 = vadd.f32 %v303_v50, %v285_v41  ;;  %v125_v48 = vsub.f32 %v85_v42, %v105_v43  ;;  %v145_v58 = vadd.f32 %v471_v9, %v123_v44 }
  0x4c   :  { %v163_v59 = vmax.f32 %v143_v40, 0.0  ;;  %v287_v60 = vsel %vm267_vm12, %v161_v25, 0.0  ;;  %v210_v29 = vmul.u32 128, %v533_v63  ;;  %v249_v61 = vadd.s32 %v208_v46, %v480_v15 }
  0x4d   :  { %vm269_vm14 = vcmp.lt.s32.totalorder %v247_v47, %v477_v11  ;;  %v305_v62 = vadd.f32 %v304_v57, %v286_v28  ;;  %v126_v0 = vsub.f32 %v86_v53, %v106_v54  ;;  %v146_v49 = vadd.f32 %v471_v9, %v124_v45 }
  0x4e   :  { %v164_v2 = vmax.f32 %v144_v51, 0.0  ;;  %v288_v3 = vsel %vm268_vm13, %v162_v52, 0.0  ;;  %v211_v4 = vmul.u32 128, %v540_v14  ;;  %v250_v5 = vadd.s32 %v209_v55, %v480_v15 }
  0x4f   :  { %vm270_vm15 = vcmp.lt.s32.totalorder %v248_v56, %v477_v11  ;;  %v306_v6 = vadd.f32 %v305_v62, %v287_v60  ;;  %v147_v30 = vadd.f32 %v471_v9, %v125_v48  ;;  %v165_v63 = vmax.f32 %v145_v58, 0.0 }
  0x50   :  { %v289_v7 = vsel %vm269_vm14, %v163_v59, 0.0  ;;  %v251_v8 = vadd.s32 %v210_v29, %v480_v15  ;;  %vm271_vm0 = vcmp.lt.s32.totalorder %v249_v61, %v477_v11  ;;  %v148_v12 = vadd.f32 %v471_v9, %v126_v0 }
  0x51   :  { %v307_v10 = vadd.f32 %v306_v6, %v288_v3  ;;  %v166_v13 = vmax.f32 %v146_v49, 0.0  ;;  %v290_v16 = vsel %vm270_vm15, %v164_v2, 0.0  ;;  %v252_v14 = vadd.s32 %v211_v4, %v480_v15 }
  0x52   :  { %vm272_vm1 = vcmp.lt.s32.totalorder %v250_v5, %v477_v11  ;;  %v167_v18 = vmax.f32 %v147_v30, 0.0  ;;  %v291_v35 = vsel %vm271_vm0, %v165_v63, 0.0  ;;  %vm273_vm2 = vcmp.lt.s32.totalorder %v251_v8, %v477_v11 }
  0x53   :  { %v308_v17 = vadd.f32 %v307_v10, %v289_v7  ;;  %v168_v20 = vmax.f32 %v148_v12, 0.0  ;;  %v292_v21 = vsel %vm272_vm1, %v166_v13, 0.0  ;;  %vm274_vm3 = vcmp.lt.s32.totalorder %v252_v14, %v477_v11 }
  0x54   :  { %v293_v23 = vsel %vm273_vm2, %v167_v18, 0.0 }
  0x55   :  { %v309_v19 = vadd.f32 %v308_v17, %v290_v16  ;;  %v294_v9 = vsel %vm274_vm3, %v168_v20, 0.0 }
  0x57   :  { %v310_v22 = vadd.f32 %v309_v19, %v291_v35 }
  0x59   :  { %v311_v26 = vadd.f32 %v310_v22, %v292_v21 }
  0x5b   :  { %v312_v27 = vadd.f32 %v311_v26, %v293_v23 }
  0x5d   :  { %v313_v15 = vadd.f32 %v312_v27, %v294_v9 }
  0x5f   :  { %316 = vst [vmem:[#allocation9] sm:$0xff] %v313_v15 }
  0x60   :  { %394 = shalt.err (!%p391_p6)
}
  0x61   :  { %s395_s20 = scalar_lea.hbm %s617_s4, 128 }
  0x62   :  { %p396_p7 = scmp.ne.s32.totalorder %s617_s4, %s395_s20  ;;  %p399_p8 = scmp.lt.u32.totalorder %s395_s20, %s617_s4 }
  0x64   :  { %p401_p9 = pnand %p399_p8, %p396_p7 }
  0x66   :  { %404 = shalt.err (!%p401_p9)
}
  0x67   :  { %326 = dma.vmem_to_hbm [thread:$0]  %s324_s1, 128, %s617_s4, [#allocation6]  }
  0x68   :  { %409 = dma.done.wait [#allocation6], 128  }
  0x69   :  { %410 = vsyncadd [#allocation6], 4294967168 }
  0x6a   :  { %330 = vsyncpa [#allocation5], 1 }
  0x6b   :  { %331 = vsyncpa [#allocation8], 1 }
  0x6c   :  { %332 = vsyncpa [#allocation6], 1 }

</bundles_post_ra>
